<compile_context>
chip_gen: v6e
topology: v6e:2x2x1
jax: 0.10.0
libtpu: 0.0.40
codegen_flags: <defaults>
</compile_context>

<pallas_src>
import functools

import jax
import jax.numpy as jnp
from jax import lax
from jax.experimental import pallas as pl
from jax.experimental.pallas import tpu as pltpu

GROUPS = 8
EPS = 1e-5


# ---------------------------------------------------------------------------
# GroupNorm statistics kernel: per-channel sum and sum-of-squares over (D,H,W).
# Grid (N, D_tiles); the output block is revisited along the D axis and used as
# an accumulator (init under pl.when at t == 0).
# ---------------------------------------------------------------------------
def _gn_stats_kernel(x_ref, sum_ref, sq_ref):
    @pl.when(pl.program_id(1) == 0)
    def _():
        sum_ref[...] = jnp.zeros_like(sum_ref)
        sq_ref[...] = jnp.zeros_like(sq_ref)

    x = x_ref[...].astype(jnp.float32)                    # (1, TD, H, W, C)
    C = x.shape[-1]
    x2 = x.reshape(-1, C)                                 # (TD*H*W, C)
    sum_ref[...] += jnp.sum(x2, axis=0, keepdims=True)[None]
    sq_ref[...] += jnp.sum(x2 * x2, axis=0, keepdims=True)[None]


def gn_stats(x, *, tile_d=None):
    N, D, H, W, C = x.shape
    TD = tile_d if tile_d is not None else min(D, 8)
    assert D % TD == 0
    T = D // TD
    return pl.pallas_call(
        _gn_stats_kernel,
        out_shape=(jax.ShapeDtypeStruct((N, 1, C), jnp.float32),
                   jax.ShapeDtypeStruct((N, 1, C), jnp.float32)),
        grid_spec=pltpu.PrefetchScalarGridSpec(
            num_scalar_prefetch=0,
            grid=(N, T),
            in_specs=[pl.BlockSpec((1, TD, H, W, C), lambda n, t: (n, t, 0, 0, 0))],
            out_specs=[pl.BlockSpec((1, 1, C), lambda n, t: (n, 0, 0)),
                       pl.BlockSpec((1, 1, C), lambda n, t: (n, 0, 0))]),
        compiler_params=pltpu.CompilerParams(
            dimension_semantics=("parallel", "arbitrary")),
    )(x)


def gn_scale_shift(ssum, ssq, gamma, beta, *, groups, eps, count):
    """Tiny (N, C)-sized JAX glue: turn channel sums into per-channel scale/shift."""
    N, _, C = ssum.shape
    assert C % groups == 0, "channels must be divisible by GroupNorm groups"
    cg = C // groups
    s = ssum[:, 0, :].reshape(N, groups, cg).sum(-1)      # (N, G)
    q = ssq[:, 0, :].reshape(N, groups, cg).sum(-1)
    n = float(count * cg)
    mean = s / n
    var = jnp.maximum(q / n - mean * mean, 0.0)           # clamp: no rsqrt(<0) NaN
    rstd = lax.rsqrt(var + eps)
    mean_c = jnp.repeat(mean, cg, axis=1)                 # (N, C)
    rstd_c = jnp.repeat(rstd, cg, axis=1)
    scale = rstd_c * gamma[None, :]
    shift = beta[None, :] - mean_c * scale
    return scale.reshape(N, 1, C), shift.reshape(N, 1, C)


# ---------------------------------------------------------------------------
# Fused kernel: [GroupNorm-apply + ReLU] + 3x3x3 conv + bias [+ residual / 1x1 proj]
# Grid (N, D_tiles).  The conv input block keeps the full D in VMEM (resident
# across the inner D axis); the D/H/W halos are assembled in a zero-padded VMEM
# scratch, so no padded copy is ever materialized in HBM.
# ---------------------------------------------------------------------------
def _fused_conv3_kernel(*refs, TD, H, W, Cin, Cout, T, apply_gn, add_residual,
                        project, Cres):
    i = 0
    x_ref = refs[i]; i += 1
    sc_ref = sh_ref = None
    if apply_gn:
        sc_ref, sh_ref = refs[i], refs[i + 1]; i += 2
    w_ref, b_ref = refs[i], refs[i + 1]; i += 2
    r_ref = wid_ref = bid_ref = None
    if add_residual:
        r_ref = refs[i]; i += 1
        if project:
            wid_ref, bid_ref = refs[i], refs[i + 1]; i += 2
    o_ref = refs[i]
    xp_ref = refs[i + 1]                                   # VMEM scratch (TD+2, H+2, W+2, Cin)

    t = pl.program_id(1)
    d0 = t * TD

    def _prep(v):                                          # GN-apply + ReLU (f32)
        v = v.astype(jnp.float32)
        if apply_gn:
            scale = sc_ref[0].astype(jnp.float32)          # (1, Cin)
            shift = sh_ref[0].astype(jnp.float32)
            v = jnp.maximum(v * scale + shift, 0.0)
        return v

    # Zero-initialize the padded scratch: halo stays 0 == conv zero padding of the
    # post-activation tensor.
    xp_ref[...] = jnp.zeros_like(xp_ref)
    # Interior depth rows of this tile.
    xp_ref[pl.ds(1, TD), pl.ds(1, H), pl.ds(1, W), :] = _prep(
        x_ref[0, pl.ds(d0, TD), :, :, :])

    # Depth halos (only where the neighbouring depth slice exists).
    @pl.when(t > 0)
    def _():
        xp_ref[pl.ds(0, 1), pl.ds(1, H), pl.ds(1, W), :] = _prep(
            x_ref[0, pl.ds(d0 - 1, 1), :, :, :])

    @pl.when(t < T - 1)
    def _():
        xp_ref[pl.ds(TD + 1, 1), pl.ds(1, H), pl.ds(1, W), :] = _prep(
            x_ref[0, pl.ds(d0 + TD, 1), :, :, :])

    # Three kw-shifted copies (the only unaligned sublane slices), reused across
    # the 9 (kd, kh) taps.
    sw = [xp_ref[:, :, pl.ds(kw, W), :] for kw in range(3)]   # each (TD+2, H+2, W, Cin)

    acc = jnp.zeros((TD * H * W, Cout), jnp.float32)
    for kd in range(3):
        for kh in range(3):
            for kw in range(3):
                patch = sw[kw][kd:kd + TD, kh:kh + H, :, :]   # leading-dim slices (cheap)
                patch = patch.reshape(TD * H * W, Cin)
                acc = acc + jnp.dot(
                    patch, w_ref[(kd * 3 + kh) * 3 + kw].astype(jnp.float32),
                    preferred_element_type=jnp.float32)

    acc = acc + b_ref[...].astype(jnp.float32)                # (1, Cout) broadcast

    if add_residual:
        r = r_ref[...].astype(jnp.float32).reshape(TD * H * W, Cres)
        if project:                                           # fused 1x1x1 projection
            r = jnp.dot(r, wid_ref[0].astype(jnp.float32),
                        preferred_element_type=jnp.float32)
            r = r + bid_ref[...].astype(jnp.float32)
        acc = acc + r

    o_ref[...] = acc.reshape(1, TD, H, W, Cout).astype(o_ref.dtype)


def fused_gn_relu_conv3(x, w, b, *, scale=None, shift=None, residual=None,
                        wid=None, bid=None, tile_d=None):
    """x: (N,D,H,W,Cin) NDHWC; w: PyTorch layout (Cout, Cin, 3, 3, 3)."""
    N, D, H, W, Cin = x.shape
    Cout = w.shape[0]
    assert w.shape[2:] == (3, 3, 3)
    apply_gn = scale is not None
    add_residual = residual is not None
    project = wid is not None
    Cres = residual.shape[-1] if add_residual else 0

    TD = tile_d if tile_d is not None else min(D, 8)
    assert D % TD == 0
    T = D // TD

    wk = jnp.transpose(w, (2, 3, 4, 1, 0)).reshape(27, Cin, Cout)

    in_specs = [pl.BlockSpec((1, D, H, W, Cin), lambda n, t: (n, 0, 0, 0, 0))]
    operands = [x]
    if apply_gn:
        in_specs += [pl.BlockSpec((1, 1, Cin), lambda n, t: (n, 0, 0)),
                     pl.BlockSpec((1, 1, Cin), lambda n, t: (n, 0, 0))]
        operands += [scale, shift]
    in_specs += [pl.BlockSpec((27, Cin, Cout), lambda n, t: (0, 0, 0)),
                 pl.BlockSpec((1, Cout), lambda n, t: (0, 0))]
    operands += [wk, b.reshape(1, Cout)]
    if add_residual:
        in_specs.append(pl.BlockSpec((1, TD, H, W, Cres), lambda n, t: (n, t, 0, 0, 0)))
        operands.append(residual)
        if project:
            widk = jnp.transpose(wid, (2, 3, 4, 1, 0)).reshape(1, Cres, Cout)
            in_specs += [pl.BlockSpec((1, Cres, Cout), lambda n, t: (0, 0, 0)),
                         pl.BlockSpec((1, Cout), lambda n, t: (0, 0))]
            operands += [widk, bid.reshape(1, Cout)]

    kern = functools.partial(
        _fused_conv3_kernel, TD=TD, H=H, W=W, Cin=Cin, Cout=Cout, T=T,
        apply_gn=apply_gn, add_residual=add_residual, project=project, Cres=Cres)

    return pl.pallas_call(
        kern,
        out_shape=jax.ShapeDtypeStruct((N, D, H, W, Cout), x.dtype),
        grid_spec=pltpu.PrefetchScalarGridSpec(
            num_scalar_prefetch=0,
            grid=(N, T),
            in_specs=in_specs,
            out_specs=pl.BlockSpec((1, TD, H, W, Cout), lambda n, t: (n, t, 0, 0, 0)),
            scratch_shapes=[pltpu.VMEM((TD + 2, H + 2, W + 2, Cin), jnp.float32)]),
        compiler_params=pltpu.CompilerParams(
            dimension_semantics=("parallel", "parallel")),
    )(*operands)


# ---------------------------------------------------------------------------
# Fused GN-apply + ReLU + residual add (+ optional 1x1x1 projection).
# Only needed for the preact=False tail (no conv follows the last GN/ReLU).
# ---------------------------------------------------------------------------
def _gn_relu_add_kernel(*refs, project, Cres):
    h_ref, sc_ref, sh_ref, r_ref = refs[0:4]
    if project:
        wid_ref, bid_ref, o_ref = refs[4], refs[5], refs[6]
    else:
        o_ref = refs[4]

    h = h_ref[...].astype(jnp.float32)                     # (1, TD, H, W, C)
    scale = sc_ref[0].astype(jnp.float32)                  # (1, C)
    shift = sh_ref[0].astype(jnp.float32)
    y = jnp.maximum(h * scale + shift, 0.0)
    if project:
        rows = y.shape[1] * y.shape[2] * y.shape[3]
        r = r_ref[...].astype(jnp.float32).reshape(rows, Cres)
        r = jnp.dot(r, wid_ref[0].astype(jnp.float32),
                    preferred_element_type=jnp.float32)
        r = r + bid_ref[...].astype(jnp.float32)
        y = y + r.reshape(y.shape)
    else:
        y = y + r_ref[...].astype(jnp.float32)
    o_ref[...] = y.astype(o_ref.dtype)


def gn_relu_add(h, scale, shift, residual, *, wid=None, bid=None, tile_d=None):
    N, D, H, W, C = h.shape
    Cres = residual.shape[-1]
    project = wid is not None
    TD = tile_d if tile_d is not None else min(D, 8)
    assert D % TD == 0
    T = D // TD

    in_specs = [pl.BlockSpec((1, TD, H, W, C), lambda n, t: (n, t, 0, 0, 0)),
                pl.BlockSpec((1, 1, C), lambda n, t: (n, 0, 0)),
                pl.BlockSpec((1, 1, C), lambda n, t: (n, 0, 0)),
                pl.BlockSpec((1, TD, H, W, Cres), lambda n, t: (n, t, 0, 0, 0))]
    operands = [h, scale, shift, residual]
    if project:
        widk = jnp.transpose(wid, (2, 3, 4, 1, 0)).reshape(1, Cres, C)
        in_specs += [pl.BlockSpec((1, Cres, C), lambda n, t: (0, 0, 0)),
                     pl.BlockSpec((1, C), lambda n, t: (0, 0))]
        operands += [widk, bid.reshape(1, C)]

    kern = functools.partial(_gn_relu_add_kernel, project=project, Cres=Cres)
    return pl.pallas_call(
        kern,
        out_shape=jax.ShapeDtypeStruct(h.shape, h.dtype),
        grid_spec=pltpu.PrefetchScalarGridSpec(
            num_scalar_prefetch=0, grid=(N, T),
            in_specs=in_specs,
            out_specs=pl.BlockSpec((1, TD, H, W, C), lambda n, t: (n, t, 0, 0, 0))),
        compiler_params=pltpu.CompilerParams(
            dimension_semantics=("parallel", "parallel")),
    )(*operands)


# ---------------------------------------------------------------------------
# Module: parameters + forward
# ---------------------------------------------------------------------------
def init_params(key, ch_in, ch_out, id=True, preact=True):
    ks = jax.random.split(key, 10)
    c1 = ch_in if preact else ch_out      # channels seen by the first GroupNorm
    p = {
        "w1": 0.05 * jax.random.normal(ks[0], (ch_out, ch_in, 3, 3, 3), jnp.float32),
        "b1": 0.02 * jax.random.normal(ks[1], (ch_out,), jnp.float32),
        "w2": 0.05 * jax.random.normal(ks[2], (ch_out, ch_out, 3, 3, 3), jnp.float32),
        "b2": 0.02 * jax.random.normal(ks[3], (ch_out,), jnp.float32),
        "gn1_g": 1.0 + 0.1 * jax.random.normal(ks[4], (c1,), jnp.float32),
        "gn1_b": 0.1 * jax.random.normal(ks[5], (c1,), jnp.float32),
        "gn2_g": 1.0 + 0.1 * jax.random.normal(ks[6], (ch_out,), jnp.float32),
        "gn2_b": 0.1 * jax.random.normal(ks[7], (ch_out,), jnp.float32),
    }
    if not (id and ch_in == ch_out):
        p["wid"] = 0.05 * jax.random.normal(ks[8], (ch_out, ch_in, 1, 1, 1), jnp.float32)
        p["bid"] = 0.02 * jax.random.normal(ks[9], (ch_out,), jnp.float32)
    return p


def res_conv_block_3d(x_ncdhw, params, *, preact=True, tile_d=None):
    """x_ncdhw: (N, C, D, H, W), same as PyTorch Conv3d input."""
    x = jnp.transpose(x_ncdhw, (0, 2, 3, 4, 1))            # -> NDHWC
    N, D, H, W, _ = x.shape
    count = D * H * W
    wid, bid = params.get("wid"), params.get("bid")

    if preact:
        s1, q1 = gn_stats(x, tile_d=tile_d)
        sc1, sh1 = gn_scale_shift(s1, q1, params["gn1_g"], params["gn1_b"],
                                  groups=GROUPS, eps=EPS, count=count)
        h = fused_gn_relu_conv3(x, params["w1"], params["b1"],
                                scale=sc1, shift=sh1, tile_d=tile_d)
        s2, q2 = gn_stats(h, tile_d=tile_d)
        sc2, sh2 = gn_scale_shift(s2, q2, params["gn2_g"], params["gn2_b"],
                                  groups=GROUPS, eps=EPS, count=count)
        out = fused_gn_relu_conv3(h, params["w2"], params["b2"],
                                  scale=sc2, shift=sh2,
                                  residual=x, wid=wid, bid=bid, tile_d=tile_d)
    else:
        h1 = fused_gn_relu_conv3(x, params["w1"], params["b1"], tile_d=tile_d)
        s1, q1 = gn_stats(h1, tile_d=tile_d)
        sc1, sh1 = gn_scale_shift(s1, q1, params["gn1_g"], params["gn1_b"],
                                  groups=GROUPS, eps=EPS, count=count)
        h2 = fused_gn_relu_conv3(h1, params["w2"], params["b2"],
                                 scale=sc1, shift=sh1, tile_d=tile_d)
        s2, q2 = gn_stats(h2, tile_d=tile_d)
        sc2, sh2 = gn_scale_shift(s2, q2, params["gn2_g"], params["gn2_b"],
                                  groups=GROUPS, eps=EPS, count=count)
        out = gn_relu_add(h2, sc2, sh2, x, wid=wid, bid=bid, tile_d=tile_d)

    return jnp.transpose(out, (0, 4, 1, 2, 3))              # -> NCDHW


# ---------------------------------------------------------------------------
# Pure-JAX reference (for correctness check)
# ---------------------------------------------------------------------------
def _ref_gn_relu(x, gamma, beta, groups=GROUPS, eps=EPS):
    N, D, H, W, C = x.shape
    cg = C // groups
    xg = x.reshape(N, D, H, W, groups, cg)
    mean = xg.mean(axis=(1, 2, 3, 5), keepdims=True)
    var = ((xg - mean) ** 2).mean(axis=(1, 2, 3, 5), keepdims=True)
    y = (xg - mean) / jnp.sqrt(var + eps)
    y = y.reshape(N, D, H, W, C) * gamma.reshape(1, 1, 1, 1, C) + beta.reshape(1, 1, 1, 1, C)
    return jnp.maximum(y, 0.0)


def _ref_conv3d(x, w, b, pad):
    wk = jnp.transpose(w, (2, 3, 4, 1, 0))                  # DHWIO
    out = lax.conv_general_dilated(
        x, wk, window_strides=(1, 1, 1), padding=[(pad, pad)] * 3,
        dimension_numbers=("NDHWC", "DHWIO", "NDHWC"),
        precision=lax.Precision.HIGHEST)
    return out + b.reshape(1, 1, 1, 1, -1)


def _ref_block(x_ncdhw, params, *, preact=True):
    x = jnp.transpose(x_ncdhw, (0, 2, 3, 4, 1))
    if preact:
        h = _ref_gn_relu(x, params["gn1_g"], params["gn1_b"])
        h = _ref_conv3d(h, params["w1"], params["b1"], 1)
        h = _ref_gn_relu(h, params["gn2_g"], params["gn2_b"])
        h = _ref_conv3d(h, params["w2"], params["b2"], 1)
    else:
        h = _ref_conv3d(x, params["w1"], params["b1"], 1)
        h = _ref_gn_relu(h, params["gn1_g"], params["gn1_b"])
        h = _ref_conv3d(h, params["w2"], params["b2"], 1)
        h = _ref_gn_relu(h, params["gn2_g"], params["gn2_b"])
    res = x if "wid" not in params else _ref_conv3d(x, params["wid"], params["bid"], 0)
    return jnp.transpose(res + h, (0, 4, 1, 2, 3))


# ---------------------------------------------------------------------------
if __name__ == "__main__":
    key = jax.random.PRNGKey(0)
    k_x, k_p1, k_p2, k_p3 = jax.random.split(key, 4)

    N, D, H, W = 2, 8, 8, 8
    ch_in = 16
    x = jax.random.normal(k_x, (N, ch_in, D, H, W), jnp.float32)

    # Config 1: ch_in == ch_out -> identity residual, preact, single D tile.
    params = init_params(k_p1, ch_in, ch_in, id=True, preact=True)
    out = jax.block_until_ready(res_conv_block_3d(x, params, preact=True))
    ref = _ref_block(x, params, preact=True)
    assert out.shape == (N, ch_in, D, H, W)
    assert jnp.allclose(out, ref, atol=1e-3, rtol=1e-3), float(jnp.max(jnp.abs(out - ref)))

    # Config 2: ch_in != ch_out -> fused 1x1x1 projection residual, preact,
    # D tiled (tile_d=4) to exercise the in-kernel depth-halo path.
    ch_out2 = 24
    params2 = init_params(k_p2, ch_in, ch_out2, id=True, preact=True)
    out2 = jax.block_until_ready(res_conv_block_3d(x, params2, preact=True, tile_d=4))
    ref2 = _ref_block(x, params2, preact=True)
    assert out2.shape == (N, ch_out2, D, H, W)
    assert jnp.allclose(out2, ref2, atol=1e-3, rtol=1e-3), float(jnp.max(jnp.abs(out2 - ref2)))

    # Config 3: post-activation variant (preact=False), identity residual.
    params3 = init_params(k_p3, ch_in, ch_in, id=True, preact=False)
    out3 = jax.block_until_ready(res_conv_block_3d(x, params3, preact=False))
    ref3 = _ref_block(x, params3, preact=False)
    assert out3.shape == (N, ch_in, D, H, W)
    assert jnp.allclose(out3, ref3, atol=1e-3, rtol=1e-3), float(jnp.max(jnp.abs(out3 - ref3)))

    print("KERNEL_OK")
</pallas_src>

<mosaic_0001>
module attributes {stable_mosaic.version = 11 : i64} {
  func.func @_gn_stats_kernel(%arg0: i32, %arg1: i32, %arg2: memref<1x8x8x8x16xf32, #tpu.memory_space<vmem>>, %arg3: memref<1x1x16xf32, #tpu.memory_space<vmem>>, %arg4: memref<1x1x16xf32, #tpu.memory_space<vmem>>) attributes {dimension_semantics = [#tpu.dimension_semantics<parallel>, #tpu.dimension_semantics<arbitrary>], iteration_bounds = array<i64: 2, 1>, scalar_prefetch = 0 : i64, scratch_operands = 0 : i64, tpu.core_type = #tpu.core_type<tc>, window_params = [{transform_indices = @transform_0, window_bounds = array<i64: 1, 8, 8, 8, 16>}, {transform_indices = @transform_1, window_bounds = array<i64: 1, 1, 16>}, {transform_indices = @transform_2, window_bounds = array<i64: 1, 1, 16>}]} {
    %c0_i32 = arith.constant 0 : i32
    %0 = arith.cmpi eq, %arg1, %c0_i32 : i32
    %1 = arith.extui %0 : i1 to i32
    %c0_i32_0 = arith.constant 0 : i32
    %2 = arith.cmpi ne, %1, %c0_i32_0 : i32
    scf.if %2 {
      %cst_18 = arith.constant 0.000000e+00 : f32
      %18 = vector.broadcast %cst_18 : f32 to vector<1x1x16xf32>
      %c0_19 = arith.constant 0 : index
      %c0_20 = arith.constant 0 : index
      %c0_21 = arith.constant 0 : index
      %19 = vector.load %arg3[%c0_19, %c0_20, %c0_21] : memref<1x1x16xf32, #tpu.memory_space<vmem>>, vector<1x1x16xf32>
      tpu.vector_store %arg3[%c0_19, %c0_20, %c0_21], %18 {strides = array<i32>} : memref<1x1x16xf32, #tpu.memory_space<vmem>>, vector<1x1x16xf32>,
      %cst_22 = arith.constant 0.000000e+00 : f32
      %20 = vector.broadcast %cst_22 : f32 to vector<1x1x16xf32>
      %c0_23 = arith.constant 0 : index
      %c0_24 = arith.constant 0 : index
      %c0_25 = arith.constant 0 : index
      %21 = vector.load %arg4[%c0_23, %c0_24, %c0_25] : memref<1x1x16xf32, #tpu.memory_space<vmem>>, vector<1x1x16xf32>
      tpu.vector_store %arg4[%c0_23, %c0_24, %c0_25], %20 {strides = array<i32>} : memref<1x1x16xf32, #tpu.memory_space<vmem>>, vector<1x1x16xf32>,
    } else {
    }
    %c0 = arith.constant 0 : index
    %c0_1 = arith.constant 0 : index
    %c0_2 = arith.constant 0 : index
    %c0_3 = arith.constant 0 : index
    %c0_4 = arith.constant 0 : index
    %3 = vector.load %arg2[%c0, %c0_1, %c0_2, %c0_3, %c0_4] : memref<1x8x8x8x16xf32, #tpu.memory_space<vmem>>, vector<1x8x8x8x16xf32>
    %4 = vector.shape_cast %3 : vector<1x8x8x8x16xf32> to vector<512x16xf32>
    %c0_5 = arith.constant 0 : index
    %c0_6 = arith.constant 0 : index
    %c0_7 = arith.constant 0 : index
    %5 = vector.load %arg3[%c0_5, %c0_6, %c0_7] : memref<1x1x16xf32, #tpu.memory_space<vmem>>, vector<1x1x16xf32>
    %cst = arith.constant dense<0.000000e+00> : vector<16xf32>
    %6 = vector.multi_reduction <add>, %4, %cst [0] : vector<512x16xf32> to vector<16xf32>
    %7 = vector.shape_cast %6 : vector<16xf32> to vector<1x16xf32>
    %8 = vector.shape_cast %7 : vector<1x16xf32> to vector<1x1x16xf32>
    %9 = arith.addf %5, %8 : vector<1x1x16xf32>
    %c0_8 = arith.constant 0 : index
    %c0_9 = arith.constant 0 : index
    %c0_10 = arith.constant 0 : index
    %10 = vector.load %arg3[%c0_8, %c0_9, %c0_10] : memref<1x1x16xf32, #tpu.memory_space<vmem>>, vector<1x1x16xf32>
    tpu.vector_store %arg3[%c0_8, %c0_9, %c0_10], %9 {strides = array<i32>} : memref<1x1x16xf32, #tpu.memory_space<vmem>>, vector<1x1x16xf32>,
    %c0_11 = arith.constant 0 : index
    %c0_12 = arith.constant 0 : index
    %c0_13 = arith.constant 0 : index
    %11 = vector.load %arg4[%c0_11, %c0_12, %c0_13] : memref<1x1x16xf32, #tpu.memory_space<vmem>>, vector<1x1x16xf32>
    %12 = arith.mulf %4, %4 : vector<512x16xf32>
    %cst_14 = arith.constant dense<0.000000e+00> : vector<16xf32>
    %13 = vector.multi_reduction <add>, %12, %cst_14 [0] : vector<512x16xf32> to vector<16xf32>
    %14 = vector.shape_cast %13 : vector<16xf32> to vector<1x16xf32>
    %15 = vector.shape_cast %14 : vector<1x16xf32> to vector<1x1x16xf32>
    %16 = arith.addf %11, %15 : vector<1x1x16xf32>
    %c0_15 = arith.constant 0 : index
    %c0_16 = arith.constant 0 : index
    %c0_17 = arith.constant 0 : index
    %17 = vector.load %arg4[%c0_15, %c0_16, %c0_17] : memref<1x1x16xf32, #tpu.memory_space<vmem>>, vector<1x1x16xf32>
    tpu.vector_store %arg4[%c0_15, %c0_16, %c0_17], %16 {strides = array<i32>} : memref<1x1x16xf32, #tpu.memory_space<vmem>>, vector<1x1x16xf32>,
    return
  }
  func.func @transform_0(%arg0: i32, %arg1: i32) -> (i32, i32, i32, i32, i32) {
    %c0_i32 = arith.constant 0 : i32
    %c0_i32_0 = arith.constant 0 : i32
    %c0_i32_1 = arith.constant 0 : i32
    %c0_i32_2 = arith.constant 0 : i32
    return %arg0, %arg1, %c0_i32, %c0_i32_0, %c0_i32_1 : i32, i32, i32, i32, i32
  }
  func.func @transform_1(%arg0: i32, %arg1: i32) -> (i32, i32, i32) {
    %c0_i32 = arith.constant 0 : i32
    %c0_i32_0 = arith.constant 0 : i32
    %c0_i32_1 = arith.constant 0 : i32
    return %arg0, %c0_i32, %c0_i32_0 : i32, i32, i32
  }
  func.func @transform_2(%arg0: i32, %arg1: i32) -> (i32, i32, i32) {
    %c0_i32 = arith.constant 0 : i32
    %c0_i32_0 = arith.constant 0 : i32
    %c0_i32_1 = arith.constant 0 : i32
    return %arg0, %c0_i32, %c0_i32_0 : i32, i32, i32
  }
}

</mosaic_0001>

<bundles_post_ra>
// kernel: tpu_custom_call.1
= control target key start
LH: loop header
LB: loop body
LE: loop exit
PB: predicated region body
PF: predicated region fallthrough
CT: control target
= control target key end

     0   :  { %8 = vsyncpa [#allocation3], 0  ;;  %s1644_s0 = inlined_call_operand.hbm [shape: f32[2,8,8,8,16], index: 0, kind: input, shape index: {}]   ;;  %s1645_s1 = inlined_call_operand.hbm [shape: f32[2,1,16], index: 1, kind: output, shape index: {0}]   ;;  %s1646_s2 = inlined_call_operand.hbm [shape: f32[2,1,16], index: 2, kind: output, shape index: {1}]  }
   0x1   :  { %10 = vsyncpa [#allocation3 + $0x1], 0 }
   0x2   :  { %11 = vsyncpa [#allocation4], 0 }
   0x3   :  { %13 = vsyncpa [#allocation4 + $0x1], 0 }
   0x4   :  { %14 = vsyncpa [#allocation7], 0 }
   0x5   :  { %16 = vsyncpa [#allocation7 + $0x1], 0  ;;  %s978_s9 = smov 0   ;;  %s980_s10 = smov 0  }
   0x6   :  { %s982_s11 = smov 0   ;;  %s984_s12 = smov 0  }
   0x7   :  { %s986_s13 = smov 0   ;;  %s988_s14 = smov 0  }
   0x8 LB: > { %s733_s15 = sadd.s32 4294967295, %s955_s14   ;;  %s734_s16 = sadd.s32 4294967294, %s955_s14   ;;  %s955_s14 = sphi %s988_s14, %s22_s14   ;;  %s951_s13 = sphi %s986_s13, %s1657_s13   ;;  %s947_s12 = sphi %s984_s12, %s1656_s12   ;;  %s943_s11 = sphi %s982_s11, %s1655_s11   ;;  %s939_s10 = sphi %s980_s10, %s1654_s10   ;;  %s935_s9 = sphi %s978_s9, %s1653_s9  }
   0x9   : > { %s34_s17 = sadd.s32 1, %s951_s13  ;;  %s43_s18 = sadd.s32 1, %s943_s11 }
   0xa   : > { %p36_p0 = scmp.ge.s32.totalorder %s34_s17, 2  ;;  %p50_p1 = scmp.ne.s32.totalorder %s943_s11, %s939_s10 }
   0xb   : > { %p51_p2 = scmp.eq.s32.totalorder %s955_s14, 0  ;;  %p56_p3 = scmp.ne.s32.totalorder %s939_s10, %s935_s9 }
   0xc   : > { %s1659_s17 = smov (%p36_p0, %s34_s17), 0  ;;  %p57_p5 = scmp.eq.s32.totalorder %s733_s15, 0 }
   0xd   : > { %p1019_p4 = por %p51_p2, %p50_p1  ;;  %s38_s20 = ssub.s32 %s951_s13, %s1659_s17 }
   0xe   : > { %p80_p6 = scmp.eq.s32.totalorder %s733_s15, 1  ;;  %p41_p7 = scmp.eq.s32.totalorder %s38_s20, 0 }
   0xf   : > { %p1025_p8 = por %p57_p5, %p56_p3  ;;  %p86_p10 = scmp.eq.s32.totalorder %s734_s16, 1 }
  0x10   : > { %p1029_p9 = por %p80_p6, %p50_p1  ;;  %p764_p13 = scmp.lt.s32.totalorder %s955_s14, 2 }
  0x11   : > { %s1034_s23 = scalar_select %p41_p7, %s943_s11, %s43_s18  }
  0x12   : > { %p1036_p11 = por %p86_p10, %p56_p3  ;;  %s132_s25 = sand.u32 1, %s943_s11  }
  0x13   : > { %s737_s26 = sshll.u32 %s132_s25, 9  ;;  %s746_s27 = sshll.u32 %s951_s13, 13 }
  0x14   : > { %s145_s30 = scalar_lea.hbm %s1644_s0, %s746_s27  ;;  %s136_s3 = scalar_lea.vmem [#allocation2], %s737_s26 }
  0x15   : > { %s146_s4 = sshll.u32 %s136_s3, 4  ;;  %p1049_p0 = pnand %p764_p13, %p1019_p4  ;;  %s147_s4 = int_to_ptr.vmem [resolvable:$true] %s146_s4 }
  0x16   : > { %p740_p1 = scmp.ge.s32.totalorder %s955_s14, 1  ;;  %s133_s6 = scalar_lea.sflag [#allocation3], %s132_s25 }
  0x17   : > { %p819_p2 = pneg %p1049_p0  ;;  %s830_s7 = scalar_lea.vmem %s147_s4, 8192 }
  0x18   : > { %p831_p3 = scmp.ne.s32.totalorder %s147_s4, %s830_s7  ;;  %s957_s8 = smov [#allocation2]  }
  0x19   : > { %s835_s15 = sshll.u32 %s957_s8, 4  ;;  %s836_s15 = int_to_ptr.vmem [resolvable:$false] %s835_s15 }
  0x1a   : > { %p833_p5 = pnand %p831_p3, %p819_p2  ;;  %s837_s16 = scalar_lea.vmem %s836_s15, 16384 }
  0x1b   : > { %p838_p7 = scmp.lt.s32.totalorder %s147_s4, %s836_s15  ;;  %p839_p10 = scmp.lt.s32.totalorder %s837_s16, %s830_s7 }
  0x1c   : > { %p834_p6 = pneg %p833_p5 }
  0x1d   : > { %p840_p12 = por %p839_p10, %p838_p7 }
  0x1f   : > { %p841_p4 = pnand %p840_p12, %p834_p6 }
  0x21   : > { %844 = shalt.err (!%p841_p4)
}
  0x22   : > { %s958_s18 = smov 128   ;;  %s959_s19 = smov 8  }
  0x23   : > { %756 = dma.hbm_to_vmem [thread:$0]  (!%p1049_p0), %s145_s30, 8192, %s147_s4, %s133_s6, %s958_s18, %s958_s18, %s959_s19  }
  0x24   : > { %p154_p13 = scmp.lt.s32.totalorder %s955_s14, 3 }
  0x26   : > { %p155_p2 = pnand %p740_p1, %p154_p13 }
  0x27   : > { %s1062_s20 = sand.u32 (!%p155_p2), 1, %s939_s10  }
  0x28   : > { %158 = sbr.rel (%p155_p2) target bundleno = 248 (0xf8), region = 24  ;;  %s741_s25 = sshll.u32 (!%p155_p2), %s1062_s20, 9 }
  0x29   : > { %s161_s26 = scalar_lea.sflag (!%p155_p2), [#allocation3], %s1062_s20  ;;  %s1066_s27 = scalar_lea.vmem (!%p155_p2), [#allocation2], %s741_s25 }
  0x2d   : > { %922 = dma.done.wait (%p1025_p8), %s161_s26, 8192  }
  0x2e   : > { %924 = vsyncadd (%p1025_p8), %s161_s26, 4294959104  ;;  %vm193_vm0 = vcmask 122880   ;;  %s1073_s28 = scalar_lea.vmem [#allocation5], %s1062_s20  ;;  %v960_v0 = vmov 0.0   ;;  %vm261_vm1 = vcmask 130048   ;;  %v196_v1 = vld [vmem:[%s1066_s27] sm:$0xff] }
  0x2f   : > { %194 = vst.msk [vmem:[%s1073_s28] sm:$0x1] %vm193_vm0, %v960_v0  ;;  %v197_v2 = vld [vmem:[%s1066_s27 + $0x8] sm:$0xff]  ;;  %v198_v3 = vld [vmem:[%s1066_s27 + $0x10] sm:$0xff]  ;;  %v262_v4 = vsel %vm261_vm1, %v196_v1, 0.0  ;;  %v199_v7 = vld [vmem:[%s1066_s27 + $0x18] sm:$0xff]  ;;  %v399_v55 = vmul.f32 %v196_v1, %v196_v1 }
  0x30   : > { %v263_v5 = vsel %vm261_vm1, %v197_v2, 0.0  ;;  %v265_v6 = vsel %vm261_vm1, %v198_v3, 0.0  ;;  %v267_v9 = vsel %vm261_vm1, %v199_v7, 0.0  ;;  %v200_v10 = vld [vmem:[%s1066_s27 + $0x20] sm:$0xff]  ;;  %v201_v13 = vld [vmem:[%s1066_s27 + $0x28] sm:$0xff]  ;;  %v1090_v16 = vld [vmem:[%s1066_s27 + $0x30] sm:$0xff]  ;;  %v400_v56 = vmul.f32 %v197_v2, %v197_v2 }
  0x31   : > { %v264_v8 = vadd.f32 %v263_v5, %v262_v4  ;;  %v269_v12 = vsel %vm261_vm1, %v200_v10, 0.0  ;;  %v271_v15 = vsel %vm261_vm1, %v201_v13, 0.0  ;;  %v273_v18 = vsel %vm261_vm1, %v1090_v16, 0.0  ;;  %v1095_v19 = vld [vmem:[%s1066_s27 + $0x38] sm:$0xff]  ;;  %v1100_v22 = vld [vmem:[%s1066_s27 + $0x40] sm:$0xff]  ;;  %v1105_v25 = vld [vmem:[%s1066_s27 + $0x48] sm:$0xff] }
  0x32   : > { %v275_v21 = vsel %vm261_vm1, %v1095_v19, 0.0  ;;  %v277_v24 = vsel %vm261_vm1, %v1100_v22, 0.0  ;;  %v279_v27 = vsel %vm261_vm1, %v1105_v25, 0.0  ;;  %v1110_v28 = vld [vmem:[%s1066_s27 + $0x50] sm:$0xff]  ;;  %v1115_v31 = vld [vmem:[%s1066_s27 + $0x58] sm:$0xff]  ;;  %v1120_v34 = vld [vmem:[%s1066_s27 + $0x60] sm:$0xff]  ;;  %v401_v59 = vmul.f32 %v198_v3, %v198_v3 }
  0x33   : > { %v266_v11 = vadd.f32 %v265_v6, %v264_v8  ;;  %v281_v30 = vsel %vm261_vm1, %v1110_v28, 0.0  ;;  %v283_v33 = vsel %vm261_vm1, %v1115_v31, 0.0  ;;  %v285_v36 = vsel %vm261_vm1, %v1120_v34, 0.0  ;;  %v1125_v37 = vld [vmem:[%s1066_s27 + $0x68] sm:$0xff]  ;;  %s1130_s21 = scalar_lea.vmem [#allocation6], %s1062_s20  ;;  %v1135_v40 = vld [vmem:[%s1066_s27 + $0x70] sm:$0xff] }
  0x34   : > { %v287_v39 = vsel %vm261_vm1, %v1125_v37, 0.0  ;;  %195 = vst.msk [vmem:[%s1130_s21] sm:$0x1] %vm193_vm0, %v960_v0  ;;  %v289_v42 = vsel %vm261_vm1, %v1135_v40, 0.0  ;;  %v1140_v43 = vld [vmem:[%s1066_s27 + $0x78] sm:$0xff]  ;;  %v1145_v46 = vld [vmem:[%s1066_s27 + $0x80] sm:$0xff]  ;;  %v402_v61 = vmul.f32 %v199_v7, %v199_v7  ;;  %v403_v4 = vmul.f32 %v200_v10, %v200_v10 }
  0x35   : > { %v268_v14 = vadd.f32 %v267_v9, %v266_v11  ;;  %v291_v45 = vsel %vm261_vm1, %v1140_v43, 0.0  ;;  %v293_v48 = vsel %vm261_vm1, %v1145_v46, 0.0  ;;  %v1150_v49 = vld [vmem:[%s1066_s27 + $0x88] sm:$0xff]  ;;  %v1155_v52 = vld [vmem:[%s1066_s27 + $0x90] sm:$0xff]  ;;  %v1160_v57 = vld [vmem:[%s1066_s27 + $0x98] sm:$0xff]  ;;  %v463_v1 = vsel %vm261_vm1, %v399_v55, 0.0 }
  0x36   : > { %v295_v51 = vsel %vm261_vm1, %v1150_v49, 0.0  ;;  %v297_v54 = vsel %vm261_vm1, %v1155_v52, 0.0  ;;  %v299_v60 = vsel %vm261_vm1, %v1160_v57, 0.0  ;;  %v1165_v62 = vld [vmem:[%s1066_s27 + $0xa0] sm:$0xff]  ;;  %v464_v2 = vsel %vm261_vm1, %v400_v56, 0.0  ;;  %v1172_v5 = vld [vmem:[%s1066_s27 + $0xa8] sm:$0xff] }
  0x37   : > { %v270_v17 = vadd.f32 %v269_v12, %v268_v14  ;;  %v301_v0 = vsel %vm261_vm1, %v1165_v62, 0.0  ;;  %v465_v6 = vadd.f32 %v464_v2, %v463_v1  ;;  %v466_v8 = vsel %vm261_vm1, %v401_v59, 0.0  ;;  %v1179_v12 = vld [vmem:[%s1066_s27 + $0xb0] sm:$0xff]  ;;  %v1227_v56 = vld [vmem:[%s1066_s27 + $0xe0] sm:$0xff]  ;;  %s742_s29 = sshll.u32 %s947_s12, 4  ;;  %s615_s30 = sshll.u32 %s1073_s28, 4  ;;  %s1548_s30 = int_to_ptr.vmem [resolvable:$true] %s615_s30 }
  0x38   : > { %v303_v7 = vsel %vm261_vm1, %v1172_v5, 0.0  ;;  %v404_v9 = vmul.f32 %v201_v13, %v201_v13  ;;  %v468_v11 = vsel %vm261_vm1, %v402_v61, 0.0  ;;  %v412_v1 = vmul.f32 %v1125_v37, %v1125_v37  ;;  %s1546_s5 = scalar_lea.hbm %s1645_s1, %s742_s29  ;;  %s599_s6 = scalar_lea.sflag [#allocation4], %s1062_s20 }
  0x39   : > { %v272_v20 = vadd.f32 %v271_v15, %v270_v17  ;;  %v467_v14 = vadd.f32 %v466_v8, %v465_v6  ;;  %v305_v15 = vsel %vm261_vm1, %v1179_v12, 0.0  ;;  %v405_v17 = vmul.f32 %v1090_v16, %v1090_v16  ;;  %s845_s7 = scalar_lea.vmem %s1548_s30, 16  ;;  %s961_s8 = smov [#allocation5]  }
  0x3a   : > { %p846_p8 = scmp.ne.s32.totalorder %s1548_s30, %s845_s7  ;;  %s849_s15 = sshll.u32 %s961_s8, 4  ;;  %s850_s15 = int_to_ptr.vmem [resolvable:$false] %s849_s15 }
  0x3b   : > { %v274_v23 = vadd.f32 %v273_v18, %v272_v20  ;;  %v470_v18 = vsel %vm261_vm1, %v403_v4, 0.0  ;;  %v1187_v20 = vld [vmem:[%s1066_s27 + $0xb8] sm:$0xff]  ;;  %s851_s16 = scalar_lea.vmem %s850_s15, 32  ;;  %p852_p1 = scmp.lt.s32.totalorder %s1548_s30, %s850_s15 }
  0x3c   : > { %v307_v13 = vsel %vm261_vm1, %v1187_v20, 0.0  ;;  %p847_p12 = pnand %p846_p8, %p1029_p9  ;;  %p853_p3 = scmp.lt.s32.totalorder %s851_s16, %s845_s7 }
  0x3d   : > { %v276_v26 = vadd.f32 %v275_v21, %v274_v23  ;;  %v469_v23 = vadd.f32 %v468_v11, %v467_v14  ;;  %v1251_v11 = vld [vmem:[%s1066_s27 + $0xf8] sm:$0xff] }
  0x3e   : > { %v323_v37 = vsel %vm261_vm1, %v1251_v11, 0.0  ;;  %p848_p0 = pneg %p847_p12  ;;  %p854_p5 = por %p853_p3, %p852_p1 }
  0x3f   : > { %v278_v29 = vadd.f32 %v277_v24, %v276_v26  ;;  %v406_v24 = vmul.f32 %v1095_v19, %v1095_v19  ;;  %v472_v26 = vsel %vm261_vm1, %v404_v9, 0.0 }
  0x40   : > { %p855_p6 = pnand %p854_p5, %p848_p0 }
  0x41   : > { %v280_v32 = vadd.f32 %v279_v27, %v278_v29  ;;  %v1195_v27 = vld [vmem:[%s1066_s27 + $0xc0] sm:$0xff] }
  0x42   : > { %v309_v16 = vsel %vm261_vm1, %v1195_v27, 0.0 }
  0x43   : > { %v282_v35 = vadd.f32 %v281_v30, %v280_v32  ;;  %v471_v30 = vadd.f32 %v470_v18, %v469_v23  ;;  %v407_v32 = vmul.f32 %v1100_v22, %v1100_v22  ;;  %v1259_v18 = vld [vmem:[%s1066_s27 + $0x100] sm:$0xff] }
  0x45   : > { %v284_v38 = vadd.f32 %v283_v33, %v282_v35  ;;  %v474_v33 = vsel %vm261_vm1, %v405_v17, 0.0  ;;  %v1203_v35 = vld [vmem:[%s1066_s27 + $0xc8] sm:$0xff]  ;;  %v488_v17 = vsel %vm261_vm1, %v412_v1, 0.0 }
  0x46   : > { %v311_v19 = vsel %vm261_vm1, %v1203_v35, 0.0 }
  0x47   : > { %v286_v41 = vadd.f32 %v285_v36, %v284_v38  ;;  %v473_v38 = vadd.f32 %v472_v26, %v471_v30  ;;  %v1267_v26 = vld [vmem:[%s1066_s27 + $0x108] sm:$0xff] }
  0x49   : > { %v288_v44 = vadd.f32 %v287_v39, %v286_v41  ;;  %v408_v39 = vmul.f32 %v1105_v25, %v1105_v25  ;;  %v476_v41 = vsel %vm261_vm1, %v406_v24, 0.0 }
  0x4b   : > { %v290_v47 = vadd.f32 %v289_v42, %v288_v44  ;;  %v1211_v42 = vld [vmem:[%s1066_s27 + $0xd0] sm:$0xff]  ;;  %v480_v55 = vsel %vm261_vm1, %v408_v39, 0.0 }
  0x4c   : > { %v313_v22 = vsel %vm261_vm1, %v1211_v42, 0.0 }
  0x4d   : > { %v292_v50 = vadd.f32 %v291_v45, %v290_v47  ;;  %v475_v45 = vadd.f32 %v474_v33, %v473_v38  ;;  %v409_v47 = vmul.f32 %v1110_v28, %v1110_v28  ;;  %v317_v28 = vsel %vm261_vm1, %v1227_v56, 0.0  ;;  %v1275_v33 = vld [vmem:[%s1066_s27 + $0x110] sm:$0xff] }
  0x4f   : > { %v294_v53 = vadd.f32 %v293_v48, %v292_v50  ;;  %v478_v48 = vsel %vm261_vm1, %v407_v32, 0.0  ;;  %v1219_v50 = vld [vmem:[%s1066_s27 + $0xd8] sm:$0xff]  ;;  %v482_v61 = vsel %vm261_vm1, %v409_v47, 0.0 }
  0x50   : > { %v315_v25 = vsel %vm261_vm1, %v1219_v50, 0.0 }
  0x51   : > { %v296_v58 = vadd.f32 %v295_v51, %v294_v53  ;;  %v477_v53 = vadd.f32 %v476_v41, %v475_v45  ;;  %v1283_v41 = vld [vmem:[%s1066_s27 + $0x118] sm:$0xff] }
  0x53   : > { %v298_v63 = vadd.f32 %v297_v54, %v296_v58  ;;  %v410_v54 = vmul.f32 %v1115_v31, %v1115_v31  ;;  %v479_v59 = vadd.f32 %v478_v48, %v477_v53  ;;  %v1291_v48 = vld [vmem:[%s1066_s27 + $0x120] sm:$0xff] }
  0x55   : > { %v300_v3 = vadd.f32 %v299_v60, %v298_v63  ;;  %v411_v60 = vmul.f32 %v1120_v34, %v1120_v34  ;;  %v1235_v63 = vld [vmem:[%s1066_s27 + $0xe8] sm:$0xff]  ;;  %v481_v4 = vadd.f32 %v480_v55, %v479_v59  ;;  %v484_v2 = vsel %vm261_vm1, %v410_v54, 0.0 }
  0x56   : > { %v319_v31 = vsel %vm261_vm1, %v1235_v63, 0.0  ;;  %v1299_v55 = vld [vmem:[%s1066_s27 + $0x128] sm:$0xff] }
  0x57   : > { %v302_v10 = vadd.f32 %v301_v0, %v300_v3  ;;  %v1243_v3 = vld [vmem:[%s1066_s27 + $0xf0] sm:$0xff]  ;;  %v483_v8 = vadd.f32 %v482_v61, %v481_v4  ;;  %v486_v9 = vsel %vm261_vm1, %v411_v60, 0.0 }
  0x58   : > { %v321_v34 = vsel %vm261_vm1, %v1243_v3, 0.0  ;;  %v1307_v61 = vld [vmem:[%s1066_s27 + $0x130] sm:$0xff] }
  0x59   : > { %v304_v21 = vadd.f32 %v303_v7, %v302_v10  ;;  %v413_v7 = vmul.f32 %v1135_v40, %v1135_v40  ;;  %v485_v14 = vadd.f32 %v484_v2, %v483_v8  ;;  %v325_v40 = vsel %vm261_vm1, %v1259_v18, 0.0  ;;  %v1315_v2 = vld [vmem:[%s1066_s27 + $0x138] sm:$0xff] }
  0x5b   : > { %v306_v29 = vadd.f32 %v305_v15, %v304_v21  ;;  %v414_v15 = vmul.f32 %v1140_v43, %v1140_v43  ;;  %v487_v23 = vadd.f32 %v486_v9, %v485_v14  ;;  %v490_v24 = vsel %vm261_vm1, %v413_v7, 0.0  ;;  %v1323_v9 = vld [vmem:[%s1066_s27 + $0x140] sm:$0xff] }
  0x5c   : > { %v327_v43 = vsel %vm261_vm1, %v1267_v26, 0.0 }
  0x5d   : > { %v308_v36 = vadd.f32 %v307_v13, %v306_v29  ;;  %v415_v13 = vmul.f32 %v1145_v46, %v1145_v46  ;;  %v489_v30 = vadd.f32 %v488_v17, %v487_v23  ;;  %v492_v32 = vsel %vm261_vm1, %v414_v15, 0.0  ;;  %v1331_v17 = vld [vmem:[%s1066_s27 + $0x148] sm:$0xff] }
  0x5e   : > { %v329_v46 = vsel %vm261_vm1, %v1275_v33, 0.0 }
  0x5f   : > { %v310_v44 = vadd.f32 %v309_v16, %v308_v36  ;;  %v416_v16 = vmul.f32 %v1150_v49, %v1150_v49  ;;  %v491_v38 = vadd.f32 %v490_v24, %v489_v30  ;;  %v494_v39 = vsel %vm261_vm1, %v415_v13, 0.0  ;;  %v1339_v24 = vld [vmem:[%s1066_s27 + $0x150] sm:$0xff] }
  0x60   : > { %v331_v49 = vsel %vm261_vm1, %v1283_v41, 0.0 }
  0x61   : > { %v312_v51 = vadd.f32 %v311_v19, %v310_v44  ;;  %v417_v19 = vmul.f32 %v1155_v52, %v1155_v52  ;;  %v493_v45 = vadd.f32 %v492_v32, %v491_v38  ;;  %v496_v47 = vsel %vm261_vm1, %v416_v16, 0.0  ;;  %v1347_v32 = vld [vmem:[%s1066_s27 + $0x158] sm:$0xff] }
  0x62   : > { %v333_v52 = vsel %vm261_vm1, %v1291_v48, 0.0 }
  0x63   : > { %v314_v58 = vadd.f32 %v313_v22, %v312_v51  ;;  %v418_v22 = vmul.f32 %v1160_v57, %v1160_v57  ;;  %v495_v53 = vadd.f32 %v494_v39, %v493_v45  ;;  %v498_v54 = vsel %vm261_vm1, %v417_v19, 0.0  ;;  %v1355_v39 = vld [vmem:[%s1066_s27 + $0x160] sm:$0xff] }
  0x64   : > { %v335_v57 = vsel %vm261_vm1, %v1299_v55, 0.0 }
  0x65   : > { %v316_v0 = vadd.f32 %v315_v25, %v314_v58  ;;  %v419_v25 = vmul.f32 %v1165_v62, %v1165_v62  ;;  %v497_v59 = vadd.f32 %v496_v47, %v495_v53  ;;  %v500_v60 = vsel %vm261_vm1, %v418_v22, 0.0  ;;  %v1363_v47 = vld [vmem:[%s1066_s27 + $0x168] sm:$0xff] }
  0x66   : > { %v337_v62 = vsel %vm261_vm1, %v1307_v61, 0.0 }
  0x67   : > { %v318_v6 = vadd.f32 %v317_v28, %v316_v0  ;;  %v420_v28 = vmul.f32 %v1172_v5, %v1172_v5  ;;  %v499_v4 = vadd.f32 %v498_v54, %v497_v59  ;;  %v502_v1 = vsel %vm261_vm1, %v419_v25, 0.0  ;;  %v1371_v54 = vld [vmem:[%s1066_s27 + $0x170] sm:$0xff] }
  0x68   : > { %v339_v5 = vsel %vm261_vm1, %v1315_v2, 0.0 }
  0x69   : > { %v320_v10 = vadd.f32 %v319_v31, %v318_v6  ;;  %v421_v31 = vmul.f32 %v1179_v12, %v1179_v12  ;;  %v501_v8 = vadd.f32 %v500_v60, %v499_v4  ;;  %v504_v7 = vsel %vm261_vm1, %v420_v28, 0.0  ;;  %v1379_v60 = vld [vmem:[%s1066_s27 + $0x178] sm:$0xff] }
  0x6a   : > { %v341_v12 = vsel %vm261_vm1, %v1323_v9, 0.0 }
  0x6b   : > { %v322_v21 = vadd.f32 %v321_v34, %v320_v10  ;;  %v422_v34 = vmul.f32 %v1187_v20, %v1187_v20  ;;  %v503_v14 = vadd.f32 %v502_v1, %v501_v8  ;;  %v506_v15 = vsel %vm261_vm1, %v421_v31, 0.0  ;;  %v1387_v1 = vld [vmem:[%s1066_s27 + $0x180] sm:$0xff] }
  0x6c   : > { %v343_v20 = vsel %vm261_vm1, %v1331_v17, 0.0 }
  0x6d   : > { %v324_v29 = vadd.f32 %v323_v37, %v322_v21  ;;  %v423_v37 = vmul.f32 %v1195_v27, %v1195_v27  ;;  %v505_v23 = vadd.f32 %v504_v7, %v503_v14  ;;  %v508_v13 = vsel %vm261_vm1, %v422_v34, 0.0  ;;  %v1395_v7 = vld [vmem:[%s1066_s27 + $0x188] sm:$0xff] }
  0x6e   : > { %v345_v27 = vsel %vm261_vm1, %v1339_v24, 0.0 }
  0x6f   : > { %v326_v36 = vadd.f32 %v325_v40, %v324_v29  ;;  %v424_v40 = vmul.f32 %v1203_v35, %v1203_v35  ;;  %v507_v30 = vadd.f32 %v506_v15, %v505_v23  ;;  %v510_v16 = vsel %vm261_vm1, %v423_v37, 0.0  ;;  %v1403_v15 = vld [vmem:[%s1066_s27 + $0x190] sm:$0xff] }
  0x70   : > { %v347_v35 = vsel %vm261_vm1, %v1347_v32, 0.0 }
  0x71   : > { %v328_v44 = vadd.f32 %v327_v43, %v326_v36  ;;  %v425_v43 = vmul.f32 %v1211_v42, %v1211_v42  ;;  %v509_v38 = vadd.f32 %v508_v13, %v507_v30  ;;  %v512_v19 = vsel %vm261_vm1, %v424_v40, 0.0  ;;  %v1411_v13 = vld [vmem:[%s1066_s27 + $0x198] sm:$0xff] }
  0x72   : > { %v349_v42 = vsel %vm261_vm1, %v1355_v39, 0.0 }
  0x73   : > { %v330_v51 = vadd.f32 %v329_v46, %v328_v44  ;;  %v426_v46 = vmul.f32 %v1219_v50, %v1219_v50  ;;  %v511_v45 = vadd.f32 %v510_v16, %v509_v38  ;;  %v514_v22 = vsel %vm261_vm1, %v425_v43, 0.0  ;;  %v1419_v16 = vld [vmem:[%s1066_s27 + $0x1a0] sm:$0xff] }
  0x74   : > { %v351_v50 = vsel %vm261_vm1, %v1363_v47, 0.0 }
  0x75   : > { %v332_v58 = vadd.f32 %v331_v49, %v330_v51  ;;  %v427_v49 = vmul.f32 %v1227_v56, %v1227_v56  ;;  %v513_v53 = vadd.f32 %v512_v19, %v511_v45  ;;  %v516_v25 = vsel %vm261_vm1, %v426_v46, 0.0  ;;  %v1427_v19 = vld [vmem:[%s1066_s27 + $0x1a8] sm:$0xff] }
  0x76   : > { %v353_v56 = vsel %vm261_vm1, %v1371_v54, 0.0 }
  0x77   : > { %v334_v0 = vadd.f32 %v333_v52, %v332_v58  ;;  %v428_v52 = vmul.f32 %v1235_v63, %v1235_v63  ;;  %v515_v59 = vadd.f32 %v514_v22, %v513_v53  ;;  %v518_v28 = vsel %vm261_vm1, %v427_v49, 0.0  ;;  %v1435_v22 = vld [vmem:[%s1066_s27 + $0x1b0] sm:$0xff] }
  0x78   : > { %v355_v63 = vsel %vm261_vm1, %v1379_v60, 0.0 }
  0x79   : > { %v336_v6 = vadd.f32 %v335_v57, %v334_v0  ;;  %v429_v57 = vmul.f32 %v1243_v3, %v1243_v3  ;;  %v517_v4 = vadd.f32 %v516_v25, %v515_v59  ;;  %v520_v31 = vsel %vm261_vm1, %v428_v52, 0.0  ;;  %v1443_v25 = vld [vmem:[%s1066_s27 + $0x1b8] sm:$0xff] }
  0x7a   : > { %v357_v3 = vsel %vm261_vm1, %v1387_v1, 0.0 }
  0x7b   : > { %v338_v10 = vadd.f32 %v337_v62, %v336_v6  ;;  %v430_v62 = vmul.f32 %v1251_v11, %v1251_v11  ;;  %v519_v8 = vadd.f32 %v518_v28, %v517_v4  ;;  %v522_v34 = vsel %vm261_vm1, %v429_v57, 0.0  ;;  %v1451_v28 = vld [vmem:[%s1066_s27 + $0x1c0] sm:$0xff] }
  0x7c   : > { %v359_v11 = vsel %vm261_vm1, %v1395_v7, 0.0 }
  0x7d   : > { %v340_v21 = vadd.f32 %v339_v5, %v338_v10  ;;  %v431_v5 = vmul.f32 %v1259_v18, %v1259_v18  ;;  %v521_v14 = vadd.f32 %v520_v31, %v519_v8  ;;  %v524_v37 = vsel %vm261_vm1, %v430_v62, 0.0  ;;  %v1459_v31 = vld [vmem:[%s1066_s27 + $0x1c8] sm:$0xff] }
  0x7e   : > { %v361_v18 = vsel %vm261_vm1, %v1403_v15, 0.0 }
  0x7f   : > { %v342_v29 = vadd.f32 %v341_v12, %v340_v21  ;;  %v432_v12 = vmul.f32 %v1267_v26, %v1267_v26  ;;  %v523_v23 = vadd.f32 %v522_v34, %v521_v14  ;;  %v526_v40 = vsel %vm261_vm1, %v431_v5, 0.0  ;;  %v1467_v34 = vld [vmem:[%s1066_s27 + $0x1d0] sm:$0xff] }
  0x80   : > { %v363_v26 = vsel %vm261_vm1, %v1411_v13, 0.0 }
  0x81   : > { %v344_v36 = vadd.f32 %v343_v20, %v342_v29  ;;  %v433_v20 = vmul.f32 %v1275_v33, %v1275_v33  ;;  %v525_v30 = vadd.f32 %v524_v37, %v523_v23  ;;  %v528_v43 = vsel %vm261_vm1, %v432_v12, 0.0  ;;  %v1475_v37 = vld [vmem:[%s1066_s27 + $0x1d8] sm:$0xff] }
  0x82   : > { %v365_v33 = vsel %vm261_vm1, %v1419_v16, 0.0 }
  0x83   : > { %v346_v44 = vadd.f32 %v345_v27, %v344_v36  ;;  %v434_v27 = vmul.f32 %v1283_v41, %v1283_v41  ;;  %v527_v38 = vadd.f32 %v526_v40, %v525_v30  ;;  %v530_v46 = vsel %vm261_vm1, %v433_v20, 0.0  ;;  %v1483_v40 = vld [vmem:[%s1066_s27 + $0x1e0] sm:$0xff] }
  0x84   : > { %v367_v41 = vsel %vm261_vm1, %v1427_v19, 0.0 }
  0x85   : > { %v348_v51 = vadd.f32 %v347_v35, %v346_v44  ;;  %v435_v35 = vmul.f32 %v1291_v48, %v1291_v48  ;;  %v529_v45 = vadd.f32 %v528_v43, %v527_v38  ;;  %v532_v49 = vsel %vm261_vm1, %v434_v27, 0.0  ;;  %v1491_v43 = vld [vmem:[%s1066_s27 + $0x1e8] sm:$0xff] }
  0x86   : > { %v369_v48 = vsel %vm261_vm1, %v1435_v22, 0.0 }
  0x87   : > { %v350_v58 = vadd.f32 %v349_v42, %v348_v51  ;;  %v436_v42 = vmul.f32 %v1299_v55, %v1299_v55  ;;  %v531_v53 = vadd.f32 %v530_v46, %v529_v45  ;;  %v534_v52 = vsel %vm261_vm1, %v435_v35, 0.0  ;;  %v1499_v46 = vld [vmem:[%s1066_s27 + $0x1f0] sm:$0xff] }
  0x88   : > { %v371_v55 = vsel %vm261_vm1, %v1443_v25, 0.0 }
  0x89   : > { %v352_v0 = vadd.f32 %v351_v50, %v350_v58  ;;  %v437_v50 = vmul.f32 %v1307_v61, %v1307_v61  ;;  %v533_v59 = vadd.f32 %v532_v49, %v531_v53  ;;  %v536_v57 = vsel %vm261_vm1, %v436_v42, 0.0  ;;  %v1507_v49 = vld [vmem:[%s1066_s27 + $0x1f8] sm:$0xff] }
  0x8a   : > { %v373_v61 = vsel %vm261_vm1, %v1451_v28, 0.0 }
  0x8b   : > { %v354_v6 = vadd.f32 %v353_v56, %v352_v0  ;;  %v438_v56 = vmul.f32 %v1315_v2, %v1315_v2  ;;  %v535_v4 = vadd.f32 %v534_v52, %v533_v59  ;;  %v538_v62 = vsel %vm261_vm1, %v437_v50, 0.0 }
  0x8c   : > { %v375_v2 = vsel %vm261_vm1, %v1459_v31, 0.0  ;;  %v447_v59 = vmul.f32 %v1387_v1, %v1387_v1  ;;  %v450_v1 = vmul.f32 %v1411_v13, %v1411_v13 }
  0x8d   : > { %v356_v10 = vadd.f32 %v355_v63, %v354_v6  ;;  %v439_v63 = vmul.f32 %v1323_v9, %v1323_v9  ;;  %v537_v8 = vadd.f32 %v536_v57, %v535_v4  ;;  %v540_v5 = vsel %vm261_vm1, %v438_v56, 0.0 }
  0x8e   : > { %v377_v9 = vsel %vm261_vm1, %v1467_v34, 0.0  ;;  %v448_v57 = vmul.f32 %v1395_v7, %v1395_v7 }
  0x8f   : > { %v358_v21 = vadd.f32 %v357_v3, %v356_v10  ;;  %v440_v3 = vmul.f32 %v1331_v17, %v1331_v17  ;;  %v539_v14 = vadd.f32 %v538_v62, %v537_v8  ;;  %v542_v12 = vsel %vm261_vm1, %v439_v63, 0.0 }
  0x90   : > { %v379_v17 = vsel %vm261_vm1, %v1475_v37, 0.0  ;;  %v558_v63 = vsel %vm261_vm1, %v447_v59, 0.0  ;;  %v560_v8 = vsel %vm261_vm1, %v448_v57, 0.0 }
  0x91   : > { %v360_v29 = vadd.f32 %v359_v11, %v358_v21  ;;  %v441_v11 = vmul.f32 %v1339_v24, %v1339_v24  ;;  %v541_v23 = vadd.f32 %v540_v5, %v539_v14  ;;  %v544_v20 = vsel %vm261_vm1, %v440_v3, 0.0 }
  0x92   : > { %v381_v24 = vsel %vm261_vm1, %v1483_v40, 0.0  ;;  %v451_v3 = vmul.f32 %v1419_v16, %v1419_v16  ;;  %v452_v14 = vmul.f32 %v1427_v19, %v1427_v19  ;;  %v454_v19 = vmul.f32 %v1443_v25, %v1443_v25 }
  0x93   : > { %v362_v36 = vadd.f32 %v361_v18, %v360_v29  ;;  %v442_v18 = vmul.f32 %v1347_v32, %v1347_v32  ;;  %v543_v30 = vadd.f32 %v542_v12, %v541_v23  ;;  %v546_v27 = vsel %vm261_vm1, %v441_v11, 0.0  ;;  %v260_v12 = vld [vmem:[%s1073_s28] sm:$0x1] }
  0x94   : > { %v383_v32 = vsel %vm261_vm1, %v1491_v43, 0.0  ;;  %v566_v23 = vsel %vm261_vm1, %v451_v3, 0.0 }
  0x95   : > { %v364_v44 = vadd.f32 %v363_v26, %v362_v36  ;;  %v443_v26 = vmul.f32 %v1355_v39, %v1355_v39  ;;  %v545_v38 = vadd.f32 %v544_v20, %v543_v30  ;;  %v548_v35 = vsel %vm261_vm1, %v442_v18, 0.0 }
  0x96   : > { %v385_v39 = vsel %vm261_vm1, %v1499_v46, 0.0  ;;  %v568_v18 = vsel %vm261_vm1, %v452_v14, 0.0 }
  0x97   : > { %v366_v51 = vadd.f32 %v365_v33, %v364_v44  ;;  %v444_v33 = vmul.f32 %v1363_v47, %v1363_v47  ;;  %v547_v45 = vadd.f32 %v546_v27, %v545_v38  ;;  %v550_v42 = vsel %vm261_vm1, %v443_v26, 0.0 }
  0x98   : > { %v387_v47 = vsel %vm261_vm1, %v1507_v49, 0.0  ;;  %v572_v26 = vsel %vm261_vm1, %v454_v19, 0.0 }
  0x99   : > { %v368_v58 = vadd.f32 %v367_v41, %v366_v51  ;;  %v445_v41 = vmul.f32 %v1371_v54, %v1371_v54  ;;  %v549_v53 = vadd.f32 %v548_v35, %v547_v45  ;;  %v552_v50 = vsel %vm261_vm1, %v444_v33, 0.0 }
  0x9b   : > { %v370_v0 = vadd.f32 %v369_v48, %v368_v58  ;;  %v446_v48 = vmul.f32 %v1379_v60, %v1379_v60  ;;  %v551_v58 = vadd.f32 %v550_v42, %v549_v53  ;;  %v554_v54 = vsel %vm261_vm1, %v445_v41, 0.0 }
  0x9c   : > { %v449_v60 = vmul.f32 %v1403_v15, %v1403_v15 }
  0x9d   : > { %v372_v6 = vadd.f32 %v371_v55, %v370_v0  ;;  %v553_v56 = vadd.f32 %v552_v50, %v551_v58  ;;  %v556_v0 = vsel %vm261_vm1, %v446_v48, 0.0 }
  0x9e   : > { %v562_v5 = vsel %vm261_vm1, %v449_v60, 0.0 }
  0x9f   : > { %v374_v10 = vadd.f32 %v373_v61, %v372_v6  ;;  %v555_v61 = vadd.f32 %v554_v54, %v553_v56 }
  0xa1   : > { %v376_v21 = vadd.f32 %v375_v2, %v374_v10  ;;  %v557_v6 = vadd.f32 %v556_v0, %v555_v61 }
  0xa3   : > { %v378_v29 = vadd.f32 %v377_v9, %v376_v21  ;;  %v559_v2 = vadd.f32 %v558_v63, %v557_v6  ;;  %v564_v9 = vsel %vm261_vm1, %v450_v1, 0.0  ;;  %v453_v21 = vmul.f32 %v1435_v22, %v1435_v22 }
  0xa4   : > { %v455_v22 = vmul.f32 %v1451_v28, %v1451_v28 }
  0xa5   : > { %v380_v36 = vadd.f32 %v379_v17, %v378_v29  ;;  %v561_v10 = vadd.f32 %v560_v8, %v559_v2  ;;  %v570_v25 = vsel %vm261_vm1, %v453_v21, 0.0 }
  0xa7   : > { %v382_v44 = vadd.f32 %v381_v24, %v380_v36  ;;  %v563_v13 = vadd.f32 %v562_v5, %v561_v10  ;;  %v456_v24 = vmul.f32 %v1459_v31, %v1459_v31 }
  0xa9   : > { %v384_v51 = vadd.f32 %v383_v32, %v382_v44  ;;  %v565_v17 = vadd.f32 %v564_v9, %v563_v13 }
  0xab   : > { %v386_v52 = vadd.f32 %v385_v39, %v384_v51  ;;  %v567_v29 = vadd.f32 %v566_v23, %v565_v17 }
  0xad   : > { %v388_v55 = vadd.f32 %v387_v47, %v386_v52  ;;  %v569_v30 = vadd.f32 %v568_v18, %v567_v29 }
  0xaf   : > { %v389_v4 = vrot.slane %v388_v55, 4 }
  0xb1   : > { %v390_v62 = vadd.f32 %v389_v4, %v388_v55 }
  0xb3   : > { %v391_v7 = vrot.slane %v390_v62, 2 }
  0xb5   : > { %v392_v15 = vadd.f32 %v391_v7, %v390_v62 }
  0xb7   : > { %v393_v11 = vrot.slane %v392_v15, 1 }
  0xb9   : > { %v394_v16 = vadd.f32 %v393_v11, %v392_v15 }
  0xbb   : > { %v395_v20 = vadd.f32 %v394_v16, %v260_v12 }
  0xbd   : > { %397 = vst.msk [vmem:[%s1073_s28] sm:$0x1] %vm193_vm0, %v395_v20 }
  0xbe   : > { %858 = shalt.err (!%p855_p6)
}
  0xbf   : > { %s859_s18 = scalar_lea.hbm %s1546_s5, 16  ;;  %s863_s26 = scalar_lea.hbm %s1645_s1, 32 }
  0xc0   : > { %p860_p7 = scmp.ne.s32.totalorder %s1546_s5, %s859_s18  ;;  %p864_p13 = scmp.lt.s32.totalorder %s1546_s5, %s1645_s1 }
  0xc1   : > { %p865_p2 = scmp.lt.s32.totalorder %s863_s26, %s859_s18 }
  0xc2   : > { %p861_p10 = pnand %p860_p7, %p1029_p9 }
  0xc3   : > { %p866_p8 = por %p865_p2, %p864_p13 }
  0xc4   : > { %p862_p4 = pneg %p861_p10 }
  0xc6   : > { %p867_p12 = pnand %p866_p8, %p862_p4 }
  0xc8   : > { %870 = shalt.err (!%p867_p12)
}
  0xc9   : > { %749 = dma.vmem_to_hbm [thread:$0]  (%p1029_p9), %s1548_s30, 16, %s1546_s5, %s599_s6   ;;  %v571_v28 = vadd.f32 %v570_v25, %v569_v30  ;;  %v457_v31 = vmul.f32 %v1467_v34, %v1467_v34  ;;  %v574_v27 = vsel %vm261_vm1, %v455_v22, 0.0  ;;  %v458_v38 = vmul.f32 %v1475_v37, %v1475_v37 }
  0xca   : > { %v576_v32 = vsel %vm261_vm1, %v456_v24, 0.0  ;;  %v459_v35 = vmul.f32 %v1483_v40, %v1483_v40  ;;  %v460_v39 = vmul.f32 %v1491_v43, %v1491_v43  ;;  %v461_v42 = vmul.f32 %v1499_v46, %v1499_v46  ;;  %s628_s30 = sshll.u32 %s1130_s21, 4  ;;  %s626_s5 = scalar_lea.hbm %s1646_s2, %s742_s29  ;;  %s629_s30 = int_to_ptr.vmem [resolvable:$true] %s628_s30 }
  0xcb   : > { %v573_v36 = vadd.f32 %v572_v26, %v571_v28  ;;  %v578_v44 = vsel %vm261_vm1, %v457_v31, 0.0  ;;  %v580_v34 = vsel %vm261_vm1, %v458_v38, 0.0  ;;  %v462_v40 = vmul.f32 %v1507_v49, %v1507_v49  ;;  %v398_v49 = vld [vmem:[%s1130_s21] sm:$0x1]  ;;  %s603_s6 = scalar_lea.sflag [#allocation7], %s1062_s20  ;;  %s871_s7 = scalar_lea.vmem %s629_s30, 16 }
  0xcc   : > { %v582_v37 = vsel %vm261_vm1, %v459_v35, 0.0  ;;  %v584_v53 = vsel %vm261_vm1, %v460_v39, 0.0  ;;  %v586_v43 = vsel %vm261_vm1, %v461_v42, 0.0  ;;  %p872_p0 = scmp.ne.s32.totalorder %s629_s30, %s871_s7  ;;  %s962_s8 = smov [#allocation6]  }
  0xcd   : > { %v575_v33 = vadd.f32 %v574_v27, %v573_v36  ;;  %v588_v50 = vsel %vm261_vm1, %v462_v40, 0.0  ;;  %s875_s15 = sshll.u32 %s962_s8, 4  ;;  %s876_s15 = int_to_ptr.vmem [resolvable:$false] %s875_s15 }
  0xce   : > { %p873_p1 = pnand %p872_p0, %p1029_p9  ;;  %s877_s16 = scalar_lea.vmem %s876_s15, 32 }
  0xcf   : > { %v577_v45 = vadd.f32 %v576_v32, %v575_v33  ;;  %p878_p5 = scmp.lt.s32.totalorder %s629_s30, %s876_s15  ;;  %p879_p6 = scmp.lt.s32.totalorder %s877_s16, %s871_s7 }
  0xd0   : > { %p874_p3 = pneg %p873_p1 }
  0xd1   : > { %v579_v41 = vadd.f32 %v578_v44, %v577_v45  ;;  %p880_p7 = por %p879_p6, %p878_p5 }
  0xd3   : > { %v581_v51 = vadd.f32 %v580_v34, %v579_v41  ;;  %p881_p10 = pnand %p880_p7, %p874_p3 }
  0xd5   : > { %v583_v47 = vadd.f32 %v582_v37, %v581_v51 }
  0xd7   : > { %v585_v48 = vadd.f32 %v584_v53, %v583_v47 }
  0xd9   : > { %v587_v46 = vadd.f32 %v586_v43, %v585_v48 }
  0xdb   : > { %v589_v52 = vadd.f32 %v588_v50, %v587_v46 }
  0xdd   : > { %v590_v58 = vrot.slane %v589_v52, 4 }
  0xdf   : > { %v591_v59 = vadd.f32 %v590_v58, %v589_v52 }
  0xe1   : > { %v592_v54 = vrot.slane %v591_v59, 2 }
  0xe3   : > { %v593_v55 = vadd.f32 %v592_v54, %v591_v59 }
  0xe5   : > { %v594_v56 = vrot.slane %v593_v55, 1 }
  0xe7   : > { %v595_v57 = vadd.f32 %v594_v56, %v593_v55 }
  0xe9   : > { %v596_v0 = vadd.f32 %v595_v57, %v398_v49 }
  0xeb   : > { %597 = vst.msk [vmem:[%s1130_s21] sm:$0x1] %vm193_vm0, %v596_v0 }
  0xec   : > { %884 = shalt.err (!%p881_p10)
}
  0xed   : > { %s885_s12 = scalar_lea.hbm %s626_s5, 16  ;;  %s889_s29 = scalar_lea.hbm %s1646_s2, 32 }
  0xee   : > { %p886_p4 = scmp.ne.s32.totalorder %s626_s5, %s885_s12  ;;  %p890_p8 = scmp.lt.s32.totalorder %s626_s5, %s1646_s2 }
  0xef   : > { %p891_p12 = scmp.lt.s32.totalorder %s889_s29, %s885_s12 }
  0xf0   : > { %p887_p13 = pnand %p886_p4, %p1029_p9 }
  0xf1   : > { %p892_p0 = por %p891_p12, %p890_p8 }
  0xf2   : > { %p888_p2 = pneg %p887_p13 }
  0xf4   : > { %p893_p1 = pnand %p892_p0, %p888_p2 }
  0xf6   : > { %896 = shalt.err (!%p893_p1)
}
  0xf7   : > { %750 = dma.vmem_to_hbm [thread:$0]  (%p1029_p9), %s629_s30, 16, %s626_s5, %s603_s6  }
  0xf8 PF: > { %s640_s25 = sand.u32 1, %s935_s9   ;;  %p1652_p3 = scmp.ge.s32.totalorder %s955_s14, 2 }
  0xf9   : > { %s641_s26 = scalar_lea.sflag [#allocation4], %s640_s25 }
  0xfa   : > { %p758_p5 = pnand %p1652_p3, %p1036_p11 }
  0xfc   : > { %p759_p6 = pneg %p758_p5 }
  0xfe   : > { %926 = dma.done.wait (%p759_p6), %s641_s26, 16  }
  0xff   : > { %928 = vsyncadd (%p759_p6), %s641_s26, 4294967280  ;;  %s649_s27 = scalar_lea.sflag [#allocation7], %s640_s25 }
 0x100   : > { %930 = dma.done.wait (%p759_p6), %s649_s27, 16  }
 0x101   : > { %932 = vsyncadd (%p759_p6), %s649_s27, 4294967280  ;;  %s22_s14 = sadd.s32 1, %s955_s14   ;;  %s1653_s9 = smov %s939_s10 }
 0x102   : > { %p19_p7 = scmp.ge.s32.totalorder %s22_s14, 4   ;;  %s1654_s10 = smov %s943_s11 }
 0x103   : > { %s1655_s11 = smov %s1034_s23  ;;  %s1656_s12 = smov %s951_s13 }
 0x104   : > { %s1657_s13 = smov %s1659_s17  ;;  %21 = sbr.rel (!%p19_p7) target bundleno = 8 (0x8), region = 90 }
 0x109   :  { %653 = vsyncpa [#allocation3], 1 }
 0x10a   :  { %655 = vsyncpa [#allocation3 + $0x1], 1 }
 0x10b   :  { %656 = vsyncpa [#allocation4], 1 }
 0x10c   :  { %658 = vsyncpa [#allocation4 + $0x1], 1 }
 0x10d   :  { %659 = vsyncpa [#allocation7], 1 }
 0x10e   :  { %661 = vsyncpa [#allocation7 + $0x1], 1 }

</bundles_post_ra>
